<compile_context>
chip_gen: v5e
topology: v5e:2x2
jax: 0.10.0
libtpu: 0.0.40
codegen_flags: <defaults>
</compile_context>

<pallas_src>
import math

import jax
import jax.numpy as jnp
from jax.experimental import pallas as pl
from jax.experimental.pallas import tpu as pltpu


def _resolve_size(total, size):
    """Resolve a torch-style view size (supports a single -1) and validate."""
    size = tuple(int(d) for d in size)
    if size.count(-1) > 1:
        raise ValueError("only one dimension of `size` may be -1")
    if -1 in size:
        rest = math.prod(d for d in size if d != -1)
        if rest == 0 or total % rest != 0:
            raise ValueError(f"cannot view {total} elements as {size}")
        size = tuple(total // rest if d == -1 else d for d in size)
    if math.prod(size) != total:
        raise ValueError(f"cannot view {total} elements as {size}")
    return size


def _row_align(itemsize):
    """Native packed-tile sublane rows: 8 for 4-byte, 16 for 2-byte, 32 for 1-byte."""
    return max(8, 32 // max(int(itemsize), 1))


def _dma_groups():
    """How many TensorCores to shard chunk DMAs across (2 on v7x, else 1)."""
    try:
        kind = jax.devices()[0].device_kind.lower()
    except Exception:
        return 1
    return 2 if "v7" in kind else 1


def _plan_chunks(extent, row_bytes, itemsize, ndim, n_groups):
    """Static (start, size) leading-dim slices, grouped per TensorCore.

    Small tensors stay a single DMA (one stream already saturates HBM on
    v5e); large ones get a few concurrent, dtype-aligned chunks so several
    descriptors are in flight (v6e), and on v7x each TensorCore owns one
    contiguous group of chunks.
    """
    mib = 1 << 20
    total_bytes = extent * row_bytes
    # Align chunk starts to the packed HBM tile so every chunk is a fully
    # dense contiguous transfer.  For a 1-D buffer, align to whole
    # (sublane x 128-lane) vreg tiles instead.
    align = _row_align(itemsize) if ndim >= 2 else 128 * _row_align(itemsize)

    if total_bytes <= 32 * mib:
        want = 1              # one DMA already saturates HBM (v5e guidance)
    elif total_bytes <= 256 * mib:
        want = 4
    else:
        want = 8              # a few more in-flight descriptors helps v6e
    want = max(want, n_groups)
    want = -(-want // n_groups) * n_groups          # equal chunks per core
    # Shrink if the leading extent cannot supply that many aligned chunks.
    while want > 1 and (extent // want) < align:
        want = want - n_groups if want > n_groups else want - 1
    want = max(want, 1)

    if want == 1:
        bounds = ((0, extent),)
    else:
        base = (extent // want) // align * align
        starts = [i * base for i in range(want)]
        bounds = tuple((s, base) for s in starts[:-1]) + (
            (starts[-1], extent - starts[-1]),)

    n_groups = min(n_groups, len(bounds))
    per = -(-len(bounds) // n_groups)
    groups = tuple(tuple(bounds[g * per:(g + 1) * per]) for g in range(n_groups))
    return tuple(g for g in groups if g)


def _make_dma_copy_kernel(groups):
    """HBM->HBM identity copy.

    Each grid step (one per TensorCore group) starts all of its chunk DMAs,
    then waits on them in issue order — maximal overlap, no extra barriers.
    """

    def kernel(x_hbm, o_hbm, sems):
        gid = pl.program_id(0)
        for g, chunks in enumerate(groups):

            @pl.when(gid == g)
            def _(chunks=chunks):
                copies = []
                for idx, (start, size) in enumerate(chunks):
                    cp = pltpu.make_async_copy(
                        x_hbm.at[pl.ds(start, size)],
                        o_hbm.at[pl.ds(start, size)],
                        sems.at[idx],
                    )
                    cp.start()
                    copies.append(cp)
                for cp in copies:
                    cp.wait()

    return kernel


def _pallas_copy(x):
    """Materialized identity copy of `x` (same shape) via direct HBM->HBM DMA."""
    itemsize = jnp.dtype(x.dtype).itemsize
    extent = x.shape[0]
    row_bytes = itemsize * math.prod(x.shape[1:])
    groups = _plan_chunks(extent, row_bytes, itemsize, x.ndim, _dma_groups())
    max_chunks = max(len(g) for g in groups)

    return pl.pallas_call(
        _make_dma_copy_kernel(groups),
        out_shape=jax.ShapeDtypeStruct(x.shape, x.dtype),
        grid=(len(groups),),
        in_specs=[pl.BlockSpec(memory_space=pl.ANY)],
        out_specs=pl.BlockSpec(memory_space=pl.ANY),
        scratch_shapes=[pltpu.SemaphoreType.DMA((max_chunks,))],
        compiler_params=pltpu.CompilerParams(
            dimension_semantics=("parallel",)),
        cost_estimate=pl.CostEstimate(
            flops=0, transcendentals=0,
            bytes_accessed=2 * x.size * itemsize),
    )(x)


def unflatten(x, size, *, materialize=False):
    """Pallas equivalent of torch `x.view(*size)`.

    Default (materialize=False): metadata-only reshape — zero HBM traffic,
    exactly what .view() is.  materialize=True: direct HBM->HBM DMA copy of
    the data followed by the (free) metadata reshape.
    """
    size = _resolve_size(x.size, size)
    if not materialize or x.size == 0 or x.ndim == 0:
        return jnp.reshape(x, size)
    out = _pallas_copy(x)
    return jnp.reshape(out, size)


class Unflatten:
    """Mirror of the PyTorch module; __init__ stores the target size."""

    def __init__(self, size, *, materialize=False):
        self.size = tuple(size)
        self.materialize = materialize

    def __call__(self, x):
        return unflatten(x, self.size, materialize=self.materialize)

    def __repr__(self):
        return "Unflatten(%s)" % ", ".join("%d" % d for d in self.size)


if __name__ == "__main__":
    key = jax.random.PRNGKey(0)

    # Flattened input (batch=2, features=4*16*16) -> unflatten to NCHW (2,4,16,16)
    x = jax.random.normal(key, (2, 4 * 16 * 16), dtype=jnp.float32)
    target = (2, 4, 16, 16)
    ref = jnp.reshape(x, target)

    # Default path: metadata-only view (no pallas_call emitted at all).
    mod = Unflatten(target)
    y_view = jax.block_until_ready(mod(x))
    assert y_view.shape == target and y_view.dtype == x.dtype
    assert bool(jnp.all(y_view == ref))

    # Materialized Pallas DMA path, jitted so the trailing reshape stays free.
    mat = jax.jit(lambda a: unflatten(a, target, materialize=True))
    y_mat = jax.block_until_ready(mat(x))
    assert y_mat.shape == target and y_mat.dtype == x.dtype
    assert bool(jnp.all(y_mat == ref))

    # Awkward (non-128-multiple) shapes: DMA runs in the native shape, no
    # canonicalizing reshape, no VMEM staging, no fallback cliff.
    x2 = jax.random.normal(jax.random.PRNGKey(1), (3, 5, 7), dtype=jnp.float32)
    y2 = jax.block_until_ready(unflatten(x2, (5, 21), materialize=True))
    assert y2.shape == (5, 21)
    assert bool(jnp.all(y2 == jnp.reshape(x2, (5, 21))))

    # bf16 exercises the dtype-aware alignment bookkeeping (single chunk here).
    x3 = jax.random.normal(jax.random.PRNGKey(2), (8, 32), dtype=jnp.bfloat16)
    y3 = jax.block_until_ready(unflatten(x3, (2, 4, 32), materialize=True))
    assert y3.shape == (2, 4, 32)
    assert bool(jnp.all(y3 == jnp.reshape(x3, (2, 4, 32))))

    print("KERNEL_OK")
</pallas_src>

<mosaic_0001>
module attributes {stable_mosaic.version = 11 : i64} {
  func.func @kernel(%arg0: i32, %arg1: memref<2x1024xf32, #tpu.memory_space<any>>, %arg2: memref<2x1024xf32, #tpu.memory_space<any>>, %arg3: memref<1x!tpu.dma_semaphore, #tpu.memory_space<semaphore_mem>>) attributes {dimension_semantics = [#tpu.dimension_semantics<parallel>], iteration_bounds = array<i64: 1>, scalar_prefetch = 0 : i64, scratch_operands = 1 : i64, tpu.core_type = #tpu.core_type<tc>, window_params = [{}, {}]} {
    %c0_i32 = arith.constant 0 : i32
    %0 = arith.cmpi eq, %arg0, %c0_i32 : i32
    %1 = arith.extui %0 : i1 to i32
    %c0_i32_0 = arith.constant 0 : i32
    %2 = arith.cmpi ne, %1, %c0_i32_0 : i32
    scf.if %2 {
      %c0_i32_1 = arith.constant 0 : i32
      %c0_i32_2 = arith.constant 0 : i32
      %c0_i32_3 = arith.constant 0 : i32
      %3 = tpu.memref_slice %arg1[%c0_i32_2, %c0_i32_3] : memref<2x1024xf32, #tpu.memory_space<any>> -> memref<2x1024xf32, #tpu.memory_space<any>>
      %c0_i32_4 = arith.constant 0 : i32
      %c0_i32_5 = arith.constant 0 : i32
      %4 = tpu.memref_slice %arg2[%c0_i32_4, %c0_i32_5] : memref<2x1024xf32, #tpu.memory_space<any>> -> memref<2x1024xf32, #tpu.memory_space<any>>
      %5 = tpu.memref_slice %arg3[%c0_i32_1] : memref<1x!tpu.dma_semaphore, #tpu.memory_space<semaphore_mem>> -> memref<1x!tpu.dma_semaphore, #tpu.memory_space<semaphore_mem>>
      %6 = tpu.memref_squeeze %5 : memref<1x!tpu.dma_semaphore, #tpu.memory_space<semaphore_mem>> -> memref<!tpu.dma_semaphore, #tpu.memory_space<semaphore_mem>>
      tpu.enqueue_dma source(%3 : memref<2x1024xf32, #tpu.memory_space<any>>) target(%4 : memref<2x1024xf32, #tpu.memory_space<any>>) target_semaphore(%6 : memref<!tpu.dma_semaphore, #tpu.memory_space<semaphore_mem>>)
      %c0_i32_6 = arith.constant 0 : i32
      %c0_i32_7 = arith.constant 0 : i32
      %c0_i32_8 = arith.constant 0 : i32
      %7 = tpu.memref_slice %arg1[%c0_i32_7, %c0_i32_8] : memref<2x1024xf32, #tpu.memory_space<any>> -> memref<2x1024xf32, #tpu.memory_space<any>>
      %c0_i32_9 = arith.constant 0 : i32
      %c0_i32_10 = arith.constant 0 : i32
      %8 = tpu.memref_slice %arg2[%c0_i32_9, %c0_i32_10] : memref<2x1024xf32, #tpu.memory_space<any>> -> memref<2x1024xf32, #tpu.memory_space<any>>
      %9 = tpu.memref_slice %arg3[%c0_i32_6] : memref<1x!tpu.dma_semaphore, #tpu.memory_space<semaphore_mem>> -> memref<1x!tpu.dma_semaphore, #tpu.memory_space<semaphore_mem>>
      %10 = tpu.memref_squeeze %9 : memref<1x!tpu.dma_semaphore, #tpu.memory_space<semaphore_mem>> -> memref<!tpu.dma_semaphore, #tpu.memory_space<semaphore_mem>>
      tpu.wait_dma2 semaphore(%10 : memref<!tpu.dma_semaphore, #tpu.memory_space<semaphore_mem>>) src(%7 : memref<2x1024xf32, #tpu.memory_space<any>>) dst(%8 : memref<2x1024xf32, #tpu.memory_space<any>>)
    } else {
    }
    return
  }
}

</mosaic_0001>

<bundles_post_ra>
// kernel: _lambda_.1
= control target key start
LH: loop header
LB: loop body
LE: loop exit
PB: predicated region body
PF: predicated region fallthrough
CT: control target
= control target key end

     0   :  { %s76_s0 = inlined_call_operand.hbm [shape: f32[2,1024], index: 0, kind: input, shape index: {}]   ;;  %s77_s1 = inlined_call_operand.vmem [shape: f32[2,1024], index: 1, kind: output, shape index: {}]  }
   0x1   :  { %s17_s8 = sshll.u32 %s76_s0, 4  ;;  %s19_s11 = sshll.u32 %s77_s1, 4  ;;  %s18_s8 = int_to_ptr.hbm [resolvable:$true] %s17_s8  ;;  %s20_s11 = int_to_ptr.vmem [resolvable:$true] %s19_s11 }
   0x2   :  { %22 = dma.hbm_to_vmem [thread:$0]  %s18_s8, 256, %s20_s11, [#allocation2] }
   0x3   :  { %58 = dma.done.wait [#allocation2], 256 }
   0x4   :  { %59 = vsyncadd [#allocation2], 4294967040 }
   0x5   :  { %27 = vsyncmov [#allocation2] }
   0x8   :  { %s28_s12 = vpop.sfrf %27 }
   0x9   :  { %p33_p0 = scmp.ne.s32.totalorder %s28_s12, 0 }
   0xb   :  { %32 = shalt.err (%p33_p0)  }

</bundles_post_ra>
